<compile_context>
chip_gen: v7x
topology: tpu7x:2x2x1
jax: 0.10.0
libtpu: 0.0.40
codegen_flags: <defaults>
</compile_context>

<pallas_src>
import math

import jax
import jax.numpy as jnp
from jax import lax
from jax.experimental import pallas as pl
from jax.experimental.pallas import tpu as pltpu

FC_WIDTH = 10  # H


# --------------------------------------------------------------------------- #
# Kernel: run T GRU steps + fc + sigmoid with the hidden state kept on-core.  #
# --------------------------------------------------------------------------- #
def pdbrain_seq_kernel(x_seq_ref,   # SMEM (T,)   f32 : scalar input per step
                       h0_ref,      # VMEM (1, H)     : initial hidden state
                       wih_ref,     # VMEM (1, 3H)    : GRU input weights (r|z|n); x is scalar
                       whh_ref,     # VMEM (H, 3H)    : GRU hidden weights (r|z|n), pre-transposed
                       bias_ref,    # VMEM (2, 3H)    : row0 = b_ih, row1 = b_hh
                       wfc_ref,     # VMEM (1, H)     : fc weight row
                       bfc_ref,     # SMEM (1,)   f32 : fc bias
                       moves_ref,   # VMEM (1, T) out : sigmoid moves, one per step
                       hout_ref):   # VMEM (1, H) out : final hidden state
    H = FC_WIDTH
    T = moves_ref.shape[-1]

    # Loop-invariant loads hoisted out of the step loop.
    w_ih = wih_ref[...]              # (1, 3H)
    w_hh = whh_ref[...]              # (H, 3H)
    b_ih = bias_ref[0:1, :]          # (1, 3H)
    b_hh = bias_ref[1:2, :]          # (1, 3H)
    w_fc = wfc_ref[...]              # (1, H)
    b_fc = bfc_ref[0]                # scalar

    lane = lax.broadcasted_iota(jnp.int32, (1, T), 1)

    def step(t, carry):
        h, logits = carry                                  # (1,H), (1,T)
        x_t = x_seq_ref[t]                                 # SMEM scalar read
        # Input-side gates: scalar * row on the VPU (no MXU push for a 1x1 dot).
        gi = x_t * w_ih + b_ih                             # (1, 3H)
        # Hidden-side gates: single (1,H)x(H,3H) MXU matmul per step.
        gh = jnp.dot(h, w_hh, preferred_element_type=jnp.float32) + b_hh
        # r and z share one sigmoid push over the first 2H lanes.
        rz = jax.nn.sigmoid(gi[:, 0:2 * H] + gh[:, 0:2 * H])   # (1, 2H)
        r = rz[:, 0:H]
        z = rz[:, H:2 * H]
        n = jnp.tanh(gi[:, 2 * H:3 * H] + r * gh[:, 2 * H:3 * H])
        h_new = (1.0 - z) * n + z * h
        # Linear(H,1) as VPU multiply + lane reduction; bias/sigmoid deferred
        # to a single post-loop pass over the whole (1, T) logits row.
        logit = jnp.sum(h_new * w_fc, axis=-1, keepdims=True)  # (1, 1)
        logits = jnp.where(lane == t, logit, logits)            # write lane t
        return h_new, logits

    h0 = h0_ref[...]
    logits0 = jnp.zeros((1, T), jnp.float32)
    h_final, logits = lax.fori_loop(0, T, step, (h0, logits0), unroll=(T <= 32))

    # One bias add + one sigmoid over the full rollout, then lane-contiguous stores.
    moves_ref[...] = jax.nn.sigmoid(logits + b_fc)
    hout_ref[...] = h_final


# --------------------------------------------------------------------------- #
# Host-side parameter handling (done ONCE, not per forward call).             #
# --------------------------------------------------------------------------- #
def init_params(key):
    """Deterministic init mimicking PyTorch's uniform(-1/sqrt(H), 1/sqrt(H))."""
    H = FC_WIDTH
    k = 1.0 / math.sqrt(H)
    keys = jax.random.split(key, 6)

    def u(k_, shape):
        return jax.random.uniform(k_, shape, jnp.float32, minval=-k, maxval=k)

    return {
        "weight_ih_l0": u(keys[0], (3 * H, 1)),   # GRU input weights  (r|z|n stacked)
        "weight_hh_l0": u(keys[1], (3 * H, H)),   # GRU hidden weights (r|z|n stacked)
        "bias_ih_l0":   u(keys[2], (3 * H,)),
        "bias_hh_l0":   u(keys[3], (3 * H,)),
        "fc_weight":    u(keys[4], (1, H)),       # Linear(FC_WIDTH, 1)
        "fc_bias":      u(keys[5], (1,)),
    }


def prepare_params(params):
    """One-time repack of PyTorch-layout params into kernel-friendly slabs."""
    H = FC_WIDTH
    w_ih = jnp.asarray(params["weight_ih_l0"], jnp.float32)   # (3H, 1)
    w_hh = jnp.asarray(params["weight_hh_l0"], jnp.float32)   # (3H, H)
    b_ih = jnp.asarray(params["bias_ih_l0"], jnp.float32)     # (3H,)
    b_hh = jnp.asarray(params["bias_hh_l0"], jnp.float32)     # (3H,)
    return {
        "wih":  w_ih.reshape(1, 3 * H),                       # (1, 3H): x is a scalar
        "whh":  w_hh.T,                                       # (H, 3H): kernel does h @ W
        "bias": jnp.stack([b_ih, b_hh], axis=0),              # (2, 3H)
        "wfc":  jnp.asarray(params["fc_weight"], jnp.float32).reshape(1, H),
        "bfc":  jnp.asarray(params["fc_bias"], jnp.float32).reshape(1),
    }


# --------------------------------------------------------------------------- #
# Wrappers.                                                                   #
# --------------------------------------------------------------------------- #
@jax.jit
def _pdbrain_rollout_impl(x_seq, h0, wih, whh, bias, wfc, bfc):
    T = x_seq.shape[0]
    H = FC_WIDTH
    return pl.pallas_call(
        pdbrain_seq_kernel,
        out_shape=(
            jax.ShapeDtypeStruct((1, T), jnp.float32),   # per-step moves
            jax.ShapeDtypeStruct((1, H), jnp.float32),   # final hidden state
        ),
        # Single kernel invocation (no grid); weights/state are full VMEM blocks,
        # the scalar input sequence and fc bias live in SMEM.
        in_specs=[
            pl.BlockSpec(memory_space=pltpu.MemorySpace.SMEM),   # x_seq
            pl.BlockSpec(memory_space=pltpu.MemorySpace.VMEM),   # h0
            pl.BlockSpec(memory_space=pltpu.MemorySpace.VMEM),   # wih
            pl.BlockSpec(memory_space=pltpu.MemorySpace.VMEM),   # whh
            pl.BlockSpec(memory_space=pltpu.MemorySpace.VMEM),   # bias
            pl.BlockSpec(memory_space=pltpu.MemorySpace.VMEM),   # wfc
            pl.BlockSpec(memory_space=pltpu.MemorySpace.SMEM),   # bfc
        ],
        out_specs=(
            pl.BlockSpec(memory_space=pltpu.MemorySpace.VMEM),
            pl.BlockSpec(memory_space=pltpu.MemorySpace.VMEM),
        ),
    )(x_seq, h0, wih, whh, bias, wfc, bfc)


def pdbrain_rollout(move_seq, state, kparams):
    """Run T fused GRU steps; returns (moves (1, T), new_state (1, 1, H))."""
    x_seq = jnp.reshape(move_seq, (-1,)).astype(jnp.float32)
    h0 = jnp.reshape(state, (1, FC_WIDTH)).astype(jnp.float32)
    moves, h_final = _pdbrain_rollout_impl(
        x_seq, h0, kparams["wih"], kparams["whh"], kparams["bias"],
        kparams["wfc"], kparams["bfc"])
    return moves, h_final.reshape(1, 1, FC_WIDTH)


def pdbrain_forward(last_move, state, kparams):
    """Exact PDBrain.forward semantics: one step -> (new_move (1,1), state (1,1,H))."""
    moves, new_state = pdbrain_rollout(jnp.reshape(last_move, (1,)), state, kparams)
    return moves.reshape(1, 1), new_state


# --------------------------------------------------------------------------- #
# Pure-JAX reference (PyTorch GRU r/z/n semantics) for validation.            #
# --------------------------------------------------------------------------- #
def pdbrain_reference_rollout(move_seq, state, params):
    H = FC_WIDTH
    w_ih, w_hh = params["weight_ih_l0"], params["weight_hh_l0"]
    b_ih, b_hh = params["bias_ih_l0"], params["bias_hh_l0"]
    xs = jnp.reshape(move_seq, (-1,)).astype(jnp.float32)
    h = jnp.reshape(state, (1, H)).astype(jnp.float32)
    moves = []
    for t in range(xs.shape[0]):
        x = xs[t].reshape(1, 1)
        gi = x @ w_ih.T + b_ih
        gh = h @ w_hh.T + b_hh
        r = jax.nn.sigmoid(gi[:, 0:H] + gh[:, 0:H])
        z = jax.nn.sigmoid(gi[:, H:2 * H] + gh[:, H:2 * H])
        n = jnp.tanh(gi[:, 2 * H:] + r * gh[:, 2 * H:])
        h = (1.0 - z) * n + z * h
        moves.append(jax.nn.sigmoid(h @ params["fc_weight"].T + params["fc_bias"]))
    return jnp.concatenate(moves, axis=-1), h.reshape(1, 1, H)


if __name__ == "__main__":
    key = jax.random.PRNGKey(0)
    pkey, xkey, skey = jax.random.split(key, 3)

    params = init_params(pkey)
    kparams = prepare_params(params)   # host-side repack, done ONCE

    T = 8
    move_seq = jax.random.normal(xkey, (T,), jnp.float32)
    state = jax.random.normal(skey, (1, 1, FC_WIDTH), jnp.float32)

    # Fused multi-step rollout (one pallas_call for all T steps).
    moves, final_state = pdbrain_rollout(move_seq, state, kparams)
    jax.block_until_ready((moves, final_state))

    ref_moves, ref_state = pdbrain_reference_rollout(move_seq, state, params)
    assert moves.shape == (1, T) and final_state.shape == (1, 1, FC_WIDTH)
    assert jnp.allclose(moves, ref_moves, atol=1e-5)
    assert jnp.allclose(final_state, ref_state, atol=1e-5)

    # Single-step call matching PDBrain.forward(last_move, state) exactly.
    new_move, new_state = pdbrain_forward(move_seq[0], state, kparams)
    jax.block_until_ready((new_move, new_state))
    ref_move1, ref_state1 = pdbrain_reference_rollout(move_seq[0:1], state, params)
    assert new_move.shape == (1, 1) and new_state.shape == (1, 1, FC_WIDTH)
    assert jnp.allclose(new_move, ref_move1.reshape(1, 1), atol=1e-5)
    assert jnp.allclose(new_state, ref_state1, atol=1e-5)

    print("KERNEL_OK")
</pallas_src>

<mosaic_0001>
module attributes {stable_mosaic.version = 11 : i64} {
  func.func @pdbrain_seq_kernel(%arg0: memref<8xf32, #tpu.memory_space<smem>>, %arg1: memref<1x10xf32, #tpu.memory_space<vmem>>, %arg2: memref<1x30xf32, #tpu.memory_space<vmem>>, %arg3: memref<10x30xf32, #tpu.memory_space<vmem>>, %arg4: memref<2x30xf32, #tpu.memory_space<vmem>>, %arg5: memref<1x10xf32, #tpu.memory_space<vmem>>, %arg6: memref<1xf32, #tpu.memory_space<smem>>, %arg7: memref<1x8xf32, #tpu.memory_space<vmem>>, %arg8: memref<1x10xf32, #tpu.memory_space<vmem>>) attributes {dimension_semantics = [], scalar_prefetch = 0 : i64, scratch_operands = 0 : i64, tpu.core_type = #tpu.core_type<tc>} {
    %c0 = arith.constant 0 : index
    %c0_0 = arith.constant 0 : index
    %0 = vector.load %arg2[%c0, %c0_0] : memref<1x30xf32, #tpu.memory_space<vmem>>, vector<1x30xf32>
    %c0_1 = arith.constant 0 : index
    %c0_2 = arith.constant 0 : index
    %1 = vector.load %arg3[%c0_1, %c0_2] : memref<10x30xf32, #tpu.memory_space<vmem>>, vector<10x30xf32>
    %c0_3 = arith.constant 0 : index
    %c0_4 = arith.constant 0 : index
    %2 = vector.load %arg4[%c0_3, %c0_4] : memref<2x30xf32, #tpu.memory_space<vmem>>, vector<1x30xf32>
    %c1 = arith.constant 1 : index
    %c0_5 = arith.constant 0 : index
    %3 = vector.load %arg4[%c1, %c0_5] : memref<2x30xf32, #tpu.memory_space<vmem>>, vector<1x30xf32>
    %c0_6 = arith.constant 0 : index
    %c0_7 = arith.constant 0 : index
    %4 = vector.load %arg5[%c0_6, %c0_7] : memref<1x10xf32, #tpu.memory_space<vmem>>, vector<1x10xf32>
    %c0_8 = arith.constant 0 : index
    %5 = memref.load %arg6[%c0_8] : memref<1xf32, #tpu.memory_space<smem>>
    %6 = tpu.iota {dimensions = array<i32: 1>} : vector<1x8xi32>
    %c0_9 = arith.constant 0 : index
    %c0_10 = arith.constant 0 : index
    %7 = vector.load %arg1[%c0_9, %c0_10] : memref<1x10xf32, #tpu.memory_space<vmem>>, vector<1x10xf32>
    %cst = arith.constant 0.000000e+00 : f32
    %8 = vector.broadcast %cst : f32 to vector<1x8xf32>
    %c0_i32 = arith.constant 0 : i32
    %9 = arith.index_cast %c0_i32 : i32 to index
    %10 = memref.load %arg0[%9] : memref<8xf32, #tpu.memory_space<smem>>
    %11 = vector.broadcast %10 : f32 to vector<1x30xf32>
    %12 = arith.mulf %11, %0 : vector<1x30xf32>
    %13 = arith.addf %12, %2 : vector<1x30xf32>
    %cst_11 = arith.constant dense<0.000000e+00> : vector<1x30xf32>
    %14 = tpu.matmul %7, %1, %cst_11 {dimension_numbers = #tpu.dot_dimension_numbers<[1], [0], [0], [1], [0, 0, 1, 1], [], []>} : vector<1x10xf32>, vector<10x30xf32>, vector<1x30xf32> -> vector<1x30xf32>
    %15 = arith.addf %14, %3 : vector<1x30xf32>
    %16 = vector.extract_strided_slice %13 {offsets = [0, 0], sizes = [1, 20], strides = [1, 1]} : vector<1x30xf32> to vector<1x20xf32>
    %17 = vector.extract_strided_slice %15 {offsets = [0, 0], sizes = [1, 20], strides = [1, 1]} : vector<1x30xf32> to vector<1x20xf32>
    %18 = arith.addf %16, %17 : vector<1x20xf32>
    %19 = arith.negf %18 : vector<1x20xf32>
    %20 = math.exp %19 : vector<1x20xf32>
    %cst_12 = arith.constant 1.000000e+00 : f32
    %21 = vector.broadcast %cst_12 : f32 to vector<1x20xf32>
    %22 = arith.addf %21, %20 : vector<1x20xf32>
    %23 = arith.divf %21, %22 : vector<1x20xf32>
    %24 = vector.extract_strided_slice %23 {offsets = [0, 0], sizes = [1, 10], strides = [1, 1]} : vector<1x20xf32> to vector<1x10xf32>
    %25 = vector.extract_strided_slice %23 {offsets = [0, 10], sizes = [1, 10], strides = [1, 1]} : vector<1x20xf32> to vector<1x10xf32>
    %26 = vector.extract_strided_slice %13 {offsets = [0, 20], sizes = [1, 10], strides = [1, 1]} : vector<1x30xf32> to vector<1x10xf32>
    %27 = vector.extract_strided_slice %15 {offsets = [0, 20], sizes = [1, 10], strides = [1, 1]} : vector<1x30xf32> to vector<1x10xf32>
    %28 = arith.mulf %24, %27 : vector<1x10xf32>
    %29 = arith.addf %26, %28 : vector<1x10xf32>
    %30 = math.tanh %29 : vector<1x10xf32>
    %cst_13 = arith.constant 1.000000e+00 : f32
    %31 = vector.broadcast %cst_13 : f32 to vector<1x10xf32>
    %32 = arith.subf %31, %25 : vector<1x10xf32>
    %33 = arith.mulf %32, %30 : vector<1x10xf32>
    %34 = arith.mulf %25, %7 : vector<1x10xf32>
    %35 = arith.addf %33, %34 : vector<1x10xf32>
    %36 = arith.mulf %35, %4 : vector<1x10xf32>
    %cst_14 = arith.constant dense<0.000000e+00> : vector<1xf32>
    %37 = vector.multi_reduction <add>, %36, %cst_14 [1] : vector<1x10xf32> to vector<1xf32>
    %38 = vector.shape_cast %37 : vector<1xf32> to vector<1x1xf32>
    %39 = vector.broadcast %c0_i32 : i32 to vector<1x8xi32>
    %40 = arith.cmpi eq, %6, %39 : vector<1x8xi32>
    %41 = vector.shape_cast %38 : vector<1x1xf32> to vector<1x1xf32>
    %42 = vector.broadcast %41 : vector<1x1xf32> to vector<1x8xf32>
    %43 = arith.select %40, %42, %8 : vector<1x8xi1>, vector<1x8xf32>
    %c1_i32 = arith.constant 1 : i32
    %44 = arith.index_cast %c1_i32 : i32 to index
    %45 = memref.load %arg0[%44] : memref<8xf32, #tpu.memory_space<smem>>
    %46 = vector.broadcast %45 : f32 to vector<1x30xf32>
    %47 = arith.mulf %46, %0 : vector<1x30xf32>
    %48 = arith.addf %47, %2 : vector<1x30xf32>
    %cst_15 = arith.constant dense<0.000000e+00> : vector<1x30xf32>
    %49 = tpu.matmul %35, %1, %cst_15 {dimension_numbers = #tpu.dot_dimension_numbers<[1], [0], [0], [1], [0, 0, 1, 1], [], []>} : vector<1x10xf32>, vector<10x30xf32>, vector<1x30xf32> -> vector<1x30xf32>
    %50 = arith.addf %49, %3 : vector<1x30xf32>
    %51 = vector.extract_strided_slice %48 {offsets = [0, 0], sizes = [1, 20], strides = [1, 1]} : vector<1x30xf32> to vector<1x20xf32>
    %52 = vector.extract_strided_slice %50 {offsets = [0, 0], sizes = [1, 20], strides = [1, 1]} : vector<1x30xf32> to vector<1x20xf32>
    %53 = arith.addf %51, %52 : vector<1x20xf32>
    %54 = arith.negf %53 : vector<1x20xf32>
    %55 = math.exp %54 : vector<1x20xf32>
    %cst_16 = arith.constant 1.000000e+00 : f32
    %56 = vector.broadcast %cst_16 : f32 to vector<1x20xf32>
    %57 = arith.addf %56, %55 : vector<1x20xf32>
    %58 = arith.divf %56, %57 : vector<1x20xf32>
    %59 = vector.extract_strided_slice %58 {offsets = [0, 0], sizes = [1, 10], strides = [1, 1]} : vector<1x20xf32> to vector<1x10xf32>
    %60 = vector.extract_strided_slice %58 {offsets = [0, 10], sizes = [1, 10], strides = [1, 1]} : vector<1x20xf32> to vector<1x10xf32>
    %61 = vector.extract_strided_slice %48 {offsets = [0, 20], sizes = [1, 10], strides = [1, 1]} : vector<1x30xf32> to vector<1x10xf32>
    %62 = vector.extract_strided_slice %50 {offsets = [0, 20], sizes = [1, 10], strides = [1, 1]} : vector<1x30xf32> to vector<1x10xf32>
    %63 = arith.mulf %59, %62 : vector<1x10xf32>
    %64 = arith.addf %61, %63 : vector<1x10xf32>
    %65 = math.tanh %64 : vector<1x10xf32>
    %cst_17 = arith.constant 1.000000e+00 : f32
    %66 = vector.broadcast %cst_17 : f32 to vector<1x10xf32>
    %67 = arith.subf %66, %60 : vector<1x10xf32>
    %68 = arith.mulf %67, %65 : vector<1x10xf32>
    %69 = arith.mulf %60, %35 : vector<1x10xf32>
    %70 = arith.addf %68, %69 : vector<1x10xf32>
    %71 = arith.mulf %70, %4 : vector<1x10xf32>
    %cst_18 = arith.constant dense<0.000000e+00> : vector<1xf32>
    %72 = vector.multi_reduction <add>, %71, %cst_18 [1] : vector<1x10xf32> to vector<1xf32>
    %73 = vector.shape_cast %72 : vector<1xf32> to vector<1x1xf32>
    %74 = vector.broadcast %c1_i32 : i32 to vector<1x8xi32>
    %75 = arith.cmpi eq, %6, %74 : vector<1x8xi32>
    %76 = vector.shape_cast %73 : vector<1x1xf32> to vector<1x1xf32>
    %77 = vector.broadcast %76 : vector<1x1xf32> to vector<1x8xf32>
    %78 = arith.select %75, %77, %43 : vector<1x8xi1>, vector<1x8xf32>
    %c2_i32 = arith.constant 2 : i32
    %79 = arith.index_cast %c2_i32 : i32 to index
    %80 = memref.load %arg0[%79] : memref<8xf32, #tpu.memory_space<smem>>
    %81 = vector.broadcast %80 : f32 to vector<1x30xf32>
    %82 = arith.mulf %81, %0 : vector<1x30xf32>
    %83 = arith.addf %82, %2 : vector<1x30xf32>
    %cst_19 = arith.constant dense<0.000000e+00> : vector<1x30xf32>
    %84 = tpu.matmul %70, %1, %cst_19 {dimension_numbers = #tpu.dot_dimension_numbers<[1], [0], [0], [1], [0, 0, 1, 1], [], []>} : vector<1x10xf32>, vector<10x30xf32>, vector<1x30xf32> -> vector<1x30xf32>
    %85 = arith.addf %84, %3 : vector<1x30xf32>
    %86 = vector.extract_strided_slice %83 {offsets = [0, 0], sizes = [1, 20], strides = [1, 1]} : vector<1x30xf32> to vector<1x20xf32>
    %87 = vector.extract_strided_slice %85 {offsets = [0, 0], sizes = [1, 20], strides = [1, 1]} : vector<1x30xf32> to vector<1x20xf32>
    %88 = arith.addf %86, %87 : vector<1x20xf32>
    %89 = arith.negf %88 : vector<1x20xf32>
    %90 = math.exp %89 : vector<1x20xf32>
    %cst_20 = arith.constant 1.000000e+00 : f32
    %91 = vector.broadcast %cst_20 : f32 to vector<1x20xf32>
    %92 = arith.addf %91, %90 : vector<1x20xf32>
    %93 = arith.divf %91, %92 : vector<1x20xf32>
    %94 = vector.extract_strided_slice %93 {offsets = [0, 0], sizes = [1, 10], strides = [1, 1]} : vector<1x20xf32> to vector<1x10xf32>
    %95 = vector.extract_strided_slice %93 {offsets = [0, 10], sizes = [1, 10], strides = [1, 1]} : vector<1x20xf32> to vector<1x10xf32>
    %96 = vector.extract_strided_slice %83 {offsets = [0, 20], sizes = [1, 10], strides = [1, 1]} : vector<1x30xf32> to vector<1x10xf32>
    %97 = vector.extract_strided_slice %85 {offsets = [0, 20], sizes = [1, 10], strides = [1, 1]} : vector<1x30xf32> to vector<1x10xf32>
    %98 = arith.mulf %94, %97 : vector<1x10xf32>
    %99 = arith.addf %96, %98 : vector<1x10xf32>
    %100 = math.tanh %99 : vector<1x10xf32>
    %cst_21 = arith.constant 1.000000e+00 : f32
    %101 = vector.broadcast %cst_21 : f32 to vector<1x10xf32>
    %102 = arith.subf %101, %95 : vector<1x10xf32>
    %103 = arith.mulf %102, %100 : vector<1x10xf32>
    %104 = arith.mulf %95, %70 : vector<1x10xf32>
    %105 = arith.addf %103, %104 : vector<1x10xf32>
    %106 = arith.mulf %105, %4 : vector<1x10xf32>
    %cst_22 = arith.constant dense<0.000000e+00> : vector<1xf32>
    %107 = vector.multi_reduction <add>, %106, %cst_22 [1] : vector<1x10xf32> to vector<1xf32>
    %108 = vector.shape_cast %107 : vector<1xf32> to vector<1x1xf32>
    %109 = vector.broadcast %c2_i32 : i32 to vector<1x8xi32>
    %110 = arith.cmpi eq, %6, %109 : vector<1x8xi32>
    %111 = vector.shape_cast %108 : vector<1x1xf32> to vector<1x1xf32>
    %112 = vector.broadcast %111 : vector<1x1xf32> to vector<1x8xf32>
    %113 = arith.select %110, %112, %78 : vector<1x8xi1>, vector<1x8xf32>
    %c3_i32 = arith.constant 3 : i32
    %114 = arith.index_cast %c3_i32 : i32 to index
    %115 = memref.load %arg0[%114] : memref<8xf32, #tpu.memory_space<smem>>
    %116 = vector.broadcast %115 : f32 to vector<1x30xf32>
    %117 = arith.mulf %116, %0 : vector<1x30xf32>
    %118 = arith.addf %117, %2 : vector<1x30xf32>
    %cst_23 = arith.constant dense<0.000000e+00> : vector<1x30xf32>
    %119 = tpu.matmul %105, %1, %cst_23 {dimension_numbers = #tpu.dot_dimension_numbers<[1], [0], [0], [1], [0, 0, 1, 1], [], []>} : vector<1x10xf32>, vector<10x30xf32>, vector<1x30xf32> -> vector<1x30xf32>
    %120 = arith.addf %119, %3 : vector<1x30xf32>
    %121 = vector.extract_strided_slice %118 {offsets = [0, 0], sizes = [1, 20], strides = [1, 1]} : vector<1x30xf32> to vector<1x20xf32>
    %122 = vector.extract_strided_slice %120 {offsets = [0, 0], sizes = [1, 20], strides = [1, 1]} : vector<1x30xf32> to vector<1x20xf32>
    %123 = arith.addf %121, %122 : vector<1x20xf32>
    %124 = arith.negf %123 : vector<1x20xf32>
    %125 = math.exp %124 : vector<1x20xf32>
    %cst_24 = arith.constant 1.000000e+00 : f32
    %126 = vector.broadcast %cst_24 : f32 to vector<1x20xf32>
    %127 = arith.addf %126, %125 : vector<1x20xf32>
    %128 = arith.divf %126, %127 : vector<1x20xf32>
    %129 = vector.extract_strided_slice %128 {offsets = [0, 0], sizes = [1, 10], strides = [1, 1]} : vector<1x20xf32> to vector<1x10xf32>
    %130 = vector.extract_strided_slice %128 {offsets = [0, 10], sizes = [1, 10], strides = [1, 1]} : vector<1x20xf32> to vector<1x10xf32>
    %131 = vector.extract_strided_slice %118 {offsets = [0, 20], sizes = [1, 10], strides = [1, 1]} : vector<1x30xf32> to vector<1x10xf32>
    %132 = vector.extract_strided_slice %120 {offsets = [0, 20], sizes = [1, 10], strides = [1, 1]} : vector<1x30xf32> to vector<1x10xf32>
    %133 = arith.mulf %129, %132 : vector<1x10xf32>
    %134 = arith.addf %131, %133 : vector<1x10xf32>
    %135 = math.tanh %134 : vector<1x10xf32>
    %cst_25 = arith.constant 1.000000e+00 : f32
    %136 = vector.broadcast %cst_25 : f32 to vector<1x10xf32>
    %137 = arith.subf %136, %130 : vector<1x10xf32>
    %138 = arith.mulf %137, %135 : vector<1x10xf32>
    %139 = arith.mulf %130, %105 : vector<1x10xf32>
    %140 = arith.addf %138, %139 : vector<1x10xf32>
    %141 = arith.mulf %140, %4 : vector<1x10xf32>
    %cst_26 = arith.constant dense<0.000000e+00> : vector<1xf32>
    %142 = vector.multi_reduction <add>, %141, %cst_26 [1] : vector<1x10xf32> to vector<1xf32>
    %143 = vector.shape_cast %142 : vector<1xf32> to vector<1x1xf32>
    %144 = vector.broadcast %c3_i32 : i32 to vector<1x8xi32>
    %145 = arith.cmpi eq, %6, %144 : vector<1x8xi32>
    %146 = vector.shape_cast %143 : vector<1x1xf32> to vector<1x1xf32>
    %147 = vector.broadcast %146 : vector<1x1xf32> to vector<1x8xf32>
    %148 = arith.select %145, %147, %113 : vector<1x8xi1>, vector<1x8xf32>
    %c4_i32 = arith.constant 4 : i32
    %149 = arith.index_cast %c4_i32 : i32 to index
    %150 = memref.load %arg0[%149] : memref<8xf32, #tpu.memory_space<smem>>
    %151 = vector.broadcast %150 : f32 to vector<1x30xf32>
    %152 = arith.mulf %151, %0 : vector<1x30xf32>
    %153 = arith.addf %152, %2 : vector<1x30xf32>
    %cst_27 = arith.constant dense<0.000000e+00> : vector<1x30xf32>
    %154 = tpu.matmul %140, %1, %cst_27 {dimension_numbers = #tpu.dot_dimension_numbers<[1], [0], [0], [1], [0, 0, 1, 1], [], []>} : vector<1x10xf32>, vector<10x30xf32>, vector<1x30xf32> -> vector<1x30xf32>
    %155 = arith.addf %154, %3 : vector<1x30xf32>
    %156 = vector.extract_strided_slice %153 {offsets = [0, 0], sizes = [1, 20], strides = [1, 1]} : vector<1x30xf32> to vector<1x20xf32>
    %157 = vector.extract_strided_slice %155 {offsets = [0, 0], sizes = [1, 20], strides = [1, 1]} : vector<1x30xf32> to vector<1x20xf32>
    %158 = arith.addf %156, %157 : vector<1x20xf32>
    %159 = arith.negf %158 : vector<1x20xf32>
    %160 = math.exp %159 : vector<1x20xf32>
    %cst_28 = arith.constant 1.000000e+00 : f32
    %161 = vector.broadcast %cst_28 : f32 to vector<1x20xf32>
    %162 = arith.addf %161, %160 : vector<1x20xf32>
    %163 = arith.divf %161, %162 : vector<1x20xf32>
    %164 = vector.extract_strided_slice %163 {offsets = [0, 0], sizes = [1, 10], strides = [1, 1]} : vector<1x20xf32> to vector<1x10xf32>
    %165 = vector.extract_strided_slice %163 {offsets = [0, 10], sizes = [1, 10], strides = [1, 1]} : vector<1x20xf32> to vector<1x10xf32>
    %166 = vector.extract_strided_slice %153 {offsets = [0, 20], sizes = [1, 10], strides = [1, 1]} : vector<1x30xf32> to vector<1x10xf32>
    %167 = vector.extract_strided_slice %155 {offsets = [0, 20], sizes = [1, 10], strides = [1, 1]} : vector<1x30xf32> to vector<1x10xf32>
    %168 = arith.mulf %164, %167 : vector<1x10xf32>
    %169 = arith.addf %166, %168 : vector<1x10xf32>
    %170 = math.tanh %169 : vector<1x10xf32>
    %cst_29 = arith.constant 1.000000e+00 : f32
    %171 = vector.broadcast %cst_29 : f32 to vector<1x10xf32>
    %172 = arith.subf %171, %165 : vector<1x10xf32>
    %173 = arith.mulf %172, %170 : vector<1x10xf32>
    %174 = arith.mulf %165, %140 : vector<1x10xf32>
    %175 = arith.addf %173, %174 : vector<1x10xf32>
    %176 = arith.mulf %175, %4 : vector<1x10xf32>
    %cst_30 = arith.constant dense<0.000000e+00> : vector<1xf32>
    %177 = vector.multi_reduction <add>, %176, %cst_30 [1] : vector<1x10xf32> to vector<1xf32>
    %178 = vector.shape_cast %177 : vector<1xf32> to vector<1x1xf32>
    %179 = vector.broadcast %c4_i32 : i32 to vector<1x8xi32>
    %180 = arith.cmpi eq, %6, %179 : vector<1x8xi32>
    %181 = vector.shape_cast %178 : vector<1x1xf32> to vector<1x1xf32>
    %182 = vector.broadcast %181 : vector<1x1xf32> to vector<1x8xf32>
    %183 = arith.select %180, %182, %148 : vector<1x8xi1>, vector<1x8xf32>
    %c5_i32 = arith.constant 5 : i32
    %184 = arith.index_cast %c5_i32 : i32 to index
    %185 = memref.load %arg0[%184] : memref<8xf32, #tpu.memory_space<smem>>
    %186 = vector.broadcast %185 : f32 to vector<1x30xf32>
    %187 = arith.mulf %186, %0 : vector<1x30xf32>
    %188 = arith.addf %187, %2 : vector<1x30xf32>
    %cst_31 = arith.constant dense<0.000000e+00> : vector<1x30xf32>
    %189 = tpu.matmul %175, %1, %cst_31 {dimension_numbers = #tpu.dot_dimension_numbers<[1], [0], [0], [1], [0, 0, 1, 1], [], []>} : vector<1x10xf32>, vector<10x30xf32>, vector<1x30xf32> -> vector<1x30xf32>
    %190 = arith.addf %189, %3 : vector<1x30xf32>
    %191 = vector.extract_strided_slice %188 {offsets = [0, 0], sizes = [1, 20], strides = [1, 1]} : vector<1x30xf32> to vector<1x20xf32>
    %192 = vector.extract_strided_slice %190 {offsets = [0, 0], sizes = [1, 20], strides = [1, 1]} : vector<1x30xf32> to vector<1x20xf32>
    %193 = arith.addf %191, %192 : vector<1x20xf32>
    %194 = arith.negf %193 : vector<1x20xf32>
    %195 = math.exp %194 : vector<1x20xf32>
    %cst_32 = arith.constant 1.000000e+00 : f32
    %196 = vector.broadcast %cst_32 : f32 to vector<1x20xf32>
    %197 = arith.addf %196, %195 : vector<1x20xf32>
    %198 = arith.divf %196, %197 : vector<1x20xf32>
    %199 = vector.extract_strided_slice %198 {offsets = [0, 0], sizes = [1, 10], strides = [1, 1]} : vector<1x20xf32> to vector<1x10xf32>
    %200 = vector.extract_strided_slice %198 {offsets = [0, 10], sizes = [1, 10], strides = [1, 1]} : vector<1x20xf32> to vector<1x10xf32>
    %201 = vector.extract_strided_slice %188 {offsets = [0, 20], sizes = [1, 10], strides = [1, 1]} : vector<1x30xf32> to vector<1x10xf32>
    %202 = vector.extract_strided_slice %190 {offsets = [0, 20], sizes = [1, 10], strides = [1, 1]} : vector<1x30xf32> to vector<1x10xf32>
    %203 = arith.mulf %199, %202 : vector<1x10xf32>
    %204 = arith.addf %201, %203 : vector<1x10xf32>
    %205 = math.tanh %204 : vector<1x10xf32>
    %cst_33 = arith.constant 1.000000e+00 : f32
    %206 = vector.broadcast %cst_33 : f32 to vector<1x10xf32>
    %207 = arith.subf %206, %200 : vector<1x10xf32>
    %208 = arith.mulf %207, %205 : vector<1x10xf32>
    %209 = arith.mulf %200, %175 : vector<1x10xf32>
    %210 = arith.addf %208, %209 : vector<1x10xf32>
    %211 = arith.mulf %210, %4 : vector<1x10xf32>
    %cst_34 = arith.constant dense<0.000000e+00> : vector<1xf32>
    %212 = vector.multi_reduction <add>, %211, %cst_34 [1] : vector<1x10xf32> to vector<1xf32>
    %213 = vector.shape_cast %212 : vector<1xf32> to vector<1x1xf32>
    %214 = vector.broadcast %c5_i32 : i32 to vector<1x8xi32>
    %215 = arith.cmpi eq, %6, %214 : vector<1x8xi32>
    %216 = vector.shape_cast %213 : vector<1x1xf32> to vector<1x1xf32>
    %217 = vector.broadcast %216 : vector<1x1xf32> to vector<1x8xf32>
    %218 = arith.select %215, %217, %183 : vector<1x8xi1>, vector<1x8xf32>
    %c6_i32 = arith.constant 6 : i32
    %219 = arith.index_cast %c6_i32 : i32 to index
    %220 = memref.load %arg0[%219] : memref<8xf32, #tpu.memory_space<smem>>
    %221 = vector.broadcast %220 : f32 to vector<1x30xf32>
    %222 = arith.mulf %221, %0 : vector<1x30xf32>
    %223 = arith.addf %222, %2 : vector<1x30xf32>
    %cst_35 = arith.constant dense<0.000000e+00> : vector<1x30xf32>
    %224 = tpu.matmul %210, %1, %cst_35 {dimension_numbers = #tpu.dot_dimension_numbers<[1], [0], [0], [1], [0, 0, 1, 1], [], []>} : vector<1x10xf32>, vector<10x30xf32>, vector<1x30xf32> -> vector<1x30xf32>
    %225 = arith.addf %224, %3 : vector<1x30xf32>
    %226 = vector.extract_strided_slice %223 {offsets = [0, 0], sizes = [1, 20], strides = [1, 1]} : vector<1x30xf32> to vector<1x20xf32>
    %227 = vector.extract_strided_slice %225 {offsets = [0, 0], sizes = [1, 20], strides = [1, 1]} : vector<1x30xf32> to vector<1x20xf32>
    %228 = arith.addf %226, %227 : vector<1x20xf32>
    %229 = arith.negf %228 : vector<1x20xf32>
    %230 = math.exp %229 : vector<1x20xf32>
    %cst_36 = arith.constant 1.000000e+00 : f32
    %231 = vector.broadcast %cst_36 : f32 to vector<1x20xf32>
    %232 = arith.addf %231, %230 : vector<1x20xf32>
    %233 = arith.divf %231, %232 : vector<1x20xf32>
    %234 = vector.extract_strided_slice %233 {offsets = [0, 0], sizes = [1, 10], strides = [1, 1]} : vector<1x20xf32> to vector<1x10xf32>
    %235 = vector.extract_strided_slice %233 {offsets = [0, 10], sizes = [1, 10], strides = [1, 1]} : vector<1x20xf32> to vector<1x10xf32>
    %236 = vector.extract_strided_slice %223 {offsets = [0, 20], sizes = [1, 10], strides = [1, 1]} : vector<1x30xf32> to vector<1x10xf32>
    %237 = vector.extract_strided_slice %225 {offsets = [0, 20], sizes = [1, 10], strides = [1, 1]} : vector<1x30xf32> to vector<1x10xf32>
    %238 = arith.mulf %234, %237 : vector<1x10xf32>
    %239 = arith.addf %236, %238 : vector<1x10xf32>
    %240 = math.tanh %239 : vector<1x10xf32>
    %cst_37 = arith.constant 1.000000e+00 : f32
    %241 = vector.broadcast %cst_37 : f32 to vector<1x10xf32>
    %242 = arith.subf %241, %235 : vector<1x10xf32>
    %243 = arith.mulf %242, %240 : vector<1x10xf32>
    %244 = arith.mulf %235, %210 : vector<1x10xf32>
    %245 = arith.addf %243, %244 : vector<1x10xf32>
    %246 = arith.mulf %245, %4 : vector<1x10xf32>
    %cst_38 = arith.constant dense<0.000000e+00> : vector<1xf32>
    %247 = vector.multi_reduction <add>, %246, %cst_38 [1] : vector<1x10xf32> to vector<1xf32>
    %248 = vector.shape_cast %247 : vector<1xf32> to vector<1x1xf32>
    %249 = vector.broadcast %c6_i32 : i32 to vector<1x8xi32>
    %250 = arith.cmpi eq, %6, %249 : vector<1x8xi32>
    %251 = vector.shape_cast %248 : vector<1x1xf32> to vector<1x1xf32>
    %252 = vector.broadcast %251 : vector<1x1xf32> to vector<1x8xf32>
    %253 = arith.select %250, %252, %218 : vector<1x8xi1>, vector<1x8xf32>
    %c7_i32 = arith.constant 7 : i32
    %254 = arith.index_cast %c7_i32 : i32 to index
    %255 = memref.load %arg0[%254] : memref<8xf32, #tpu.memory_space<smem>>
    %256 = vector.broadcast %255 : f32 to vector<1x30xf32>
    %257 = arith.mulf %256, %0 : vector<1x30xf32>
    %258 = arith.addf %257, %2 : vector<1x30xf32>
    %cst_39 = arith.constant dense<0.000000e+00> : vector<1x30xf32>
    %259 = tpu.matmul %245, %1, %cst_39 {dimension_numbers = #tpu.dot_dimension_numbers<[1], [0], [0], [1], [0, 0, 1, 1], [], []>} : vector<1x10xf32>, vector<10x30xf32>, vector<1x30xf32> -> vector<1x30xf32>
    %260 = arith.addf %259, %3 : vector<1x30xf32>
    %261 = vector.extract_strided_slice %258 {offsets = [0, 0], sizes = [1, 20], strides = [1, 1]} : vector<1x30xf32> to vector<1x20xf32>
    %262 = vector.extract_strided_slice %260 {offsets = [0, 0], sizes = [1, 20], strides = [1, 1]} : vector<1x30xf32> to vector<1x20xf32>
    %263 = arith.addf %261, %262 : vector<1x20xf32>
    %264 = arith.negf %263 : vector<1x20xf32>
    %265 = math.exp %264 : vector<1x20xf32>
    %cst_40 = arith.constant 1.000000e+00 : f32
    %266 = vector.broadcast %cst_40 : f32 to vector<1x20xf32>
    %267 = arith.addf %266, %265 : vector<1x20xf32>
    %268 = arith.divf %266, %267 : vector<1x20xf32>
    %269 = vector.extract_strided_slice %268 {offsets = [0, 0], sizes = [1, 10], strides = [1, 1]} : vector<1x20xf32> to vector<1x10xf32>
    %270 = vector.extract_strided_slice %268 {offsets = [0, 10], sizes = [1, 10], strides = [1, 1]} : vector<1x20xf32> to vector<1x10xf32>
    %271 = vector.extract_strided_slice %258 {offsets = [0, 20], sizes = [1, 10], strides = [1, 1]} : vector<1x30xf32> to vector<1x10xf32>
    %272 = vector.extract_strided_slice %260 {offsets = [0, 20], sizes = [1, 10], strides = [1, 1]} : vector<1x30xf32> to vector<1x10xf32>
    %273 = arith.mulf %269, %272 : vector<1x10xf32>
    %274 = arith.addf %271, %273 : vector<1x10xf32>
    %275 = math.tanh %274 : vector<1x10xf32>
    %cst_41 = arith.constant 1.000000e+00 : f32
    %276 = vector.broadcast %cst_41 : f32 to vector<1x10xf32>
    %277 = arith.subf %276, %270 : vector<1x10xf32>
    %278 = arith.mulf %277, %275 : vector<1x10xf32>
    %279 = arith.mulf %270, %245 : vector<1x10xf32>
    %280 = arith.addf %278, %279 : vector<1x10xf32>
    %281 = arith.mulf %280, %4 : vector<1x10xf32>
    %cst_42 = arith.constant dense<0.000000e+00> : vector<1xf32>
    %282 = vector.multi_reduction <add>, %281, %cst_42 [1] : vector<1x10xf32> to vector<1xf32>
    %283 = vector.shape_cast %282 : vector<1xf32> to vector<1x1xf32>
    %284 = vector.broadcast %c7_i32 : i32 to vector<1x8xi32>
    %285 = arith.cmpi eq, %6, %284 : vector<1x8xi32>
    %286 = vector.shape_cast %283 : vector<1x1xf32> to vector<1x1xf32>
    %287 = vector.broadcast %286 : vector<1x1xf32> to vector<1x8xf32>
    %288 = arith.select %285, %287, %253 : vector<1x8xi1>, vector<1x8xf32>
    %c8_i32 = arith.constant 8 : i32
    %289 = vector.broadcast %5 : f32 to vector<1x8xf32>
    %290 = arith.addf %288, %289 : vector<1x8xf32>
    %291 = arith.negf %290 : vector<1x8xf32>
    %292 = math.exp %291 : vector<1x8xf32>
    %cst_43 = arith.constant 1.000000e+00 : f32
    %293 = vector.broadcast %cst_43 : f32 to vector<1x8xf32>
    %294 = arith.addf %293, %292 : vector<1x8xf32>
    %295 = arith.divf %293, %294 : vector<1x8xf32>
    %c0_44 = arith.constant 0 : index
    %c0_45 = arith.constant 0 : index
    %296 = vector.load %arg7[%c0_44, %c0_45] : memref<1x8xf32, #tpu.memory_space<vmem>>, vector<1x8xf32>
    tpu.vector_store %arg7[%c0_44, %c0_45], %295 {strides = array<i32>} : memref<1x8xf32, #tpu.memory_space<vmem>>, vector<1x8xf32>,
    %c0_46 = arith.constant 0 : index
    %c0_47 = arith.constant 0 : index
    %297 = vector.load %arg8[%c0_46, %c0_47] : memref<1x10xf32, #tpu.memory_space<vmem>>, vector<1x10xf32>
    tpu.vector_store %arg8[%c0_46, %c0_47], %280 {strides = array<i32>} : memref<1x10xf32, #tpu.memory_space<vmem>>, vector<1x10xf32>,
    return
  }
}

</mosaic_0001>

<bundles_post_ra>
// kernel: _pdbrain_rollout_impl.1
= control target key start
LH: loop header
LB: loop body
LE: loop exit
PB: predicated region body
PF: predicated region fallthrough
CT: control target
= control target key end

     0   :  { %15 = vsyncpa [#allocation6], 0  ;;  %s1850_s0 = inlined_call_operand.vmem [shape: f32[8], index: 0, kind: input, shape index: {}]   ;;  %s1851_s1 = inlined_call_operand.vmem [shape: f32[1,10], index: 1, kind: input, shape index: {}]   ;;  %s1852_s2 = inlined_call_operand.vmem [shape: f32[1,30], index: 2, kind: input, shape index: {}]   ;;  %s1853_s3 = inlined_call_operand.hbm [shape: f32[10,30], index: 3, kind: input, shape index: {}]   ;;  %s1854_s4 = inlined_call_operand.vmem [shape: f32[2,30], index: 4, kind: input, shape index: {}]   ;;  %s1855_s5 = inlined_call_operand.vmem [shape: f32[1,10], index: 5, kind: input, shape index: {}]   ;;  %s1856_s6 = inlined_call_operand.<no memory space> [shape: f32[1], index: 6, kind: input, shape index: {}]   ;;  %s1857_s7 = inlined_call_operand.hbm [shape: f32[1,8], index: 7, kind: output, shape index: {0}]   ;;  %s1858_s8 = inlined_call_operand.hbm [shape: f32[1,10], index: 8, kind: output, shape index: {1}]  }
   0x1   :  { %16 = vsyncpa [#allocation4], 0 }
   0x2   :  { %17 = vsyncpa [#allocation5], 0 }
   0x3   :  { %18 = vsyncpa [#allocation10], 0  ;;  %s25_s29 = sshll.u32 %s1850_s0, 4  ;;  %s26_s29 = int_to_ptr.vmem [resolvable:$true] %s25_s29 }
   0x4   :  { %s1431_s30 = scalar_lea.vmem %s26_s29, 16  ;;  %p1436_p1 = scmp.lt.s32.totalorder %s26_s29, %s26_s29 }
   0x5   :  { %p1432_p0 = scmp.ne.s32.totalorder %s26_s29, %s1431_s30  ;;  %p1437_p2 = scmp.lt.s32.totalorder %s1431_s30, %s1431_s30 }
   0x7   :  { %p1438_p3 = por %p1437_p2, %p1436_p1 }
   0x9   :  { %p1439_p4 = pnand %p1438_p3, %p1432_p0 }
   0xb   :  { %1442 = shalt.err (!%p1439_p4)
}
   0xc   :  { %s1517_s9 = smov [#allocation3]   ;;  %s1518_s10 = smov [#allocation7]  }
   0xd   :  { %28 = dma.vmem_to_smem %s26_s29, 16, %s1517_s9, [#allocation6]  }
   0xe   :  { %s38_s11 = sshll.u32 %s1518_s10, 4  ;;  %s1443_s14 = scalar_lea.hbm %s1853_s3, 256  ;;  %s39_s11 = int_to_ptr.vmem [resolvable:$true] %s38_s11 }
   0xf   :  { %p1444_p5 = scmp.ne.s32.totalorder %s1853_s3, %s1443_s14  ;;  %p1447_p6 = scmp.lt.u32.totalorder %s1443_s14, %s1853_s3 }
  0x11   :  { %p1449_p7 = pnand %p1447_p6, %p1444_p5 }
  0x13   :  { %1452 = shalt.err (!%p1449_p7)
}
  0x14   :  { %s1453_s18 = scalar_lea.vmem %s39_s11, 256  ;;  %p1458_p9 = scmp.lt.s32.totalorder %s39_s11, %s39_s11 }
  0x15   :  { %p1454_p8 = scmp.ne.s32.totalorder %s39_s11, %s1453_s18  ;;  %p1459_p10 = scmp.lt.s32.totalorder %s1453_s18, %s1453_s18 }
  0x17   :  { %p1460_p11 = por %p1459_p10, %p1458_p9 }
  0x19   :  { %p1461_p12 = pnand %p1460_p11, %p1454_p8 }
  0x1b   :  { %1464 = shalt.err (!%p1461_p12)
}
  0x1c   :  { %s1519_s19 = smov 128   ;;  %s1520_s20 = smov 8  }
  0x1d   :  { %44 = dma.hbm_to_vmem [thread:$0]  %s1853_s3, 256, %s39_s11, [#allocation4], %s1519_s19, %s1519_s19, %s1520_s20  }
  0x1e   :  { %1509 = dma.done.wait [#allocation6], 16  }
  0x1f   :  { %1510 = vsyncadd [#allocation6], 4294967280 }
  0x20   :  { %1511 = dma.done.wait [#allocation4], 256  }
  0x21   :  { %1512 = vsyncadd [#allocation4], 4294967040 }
  0x22   :  { %57 = sfence }
  0x23   :  { %v59_v0 = vld [vmem:[#allocation7] sm:$0xff]  ;;  %v60_v1 = vld [vmem:[#allocation7 + $0x8] sm:$0x3]  ;;  %vm76_vm0 = vcmask 1041408   ;;  %v1521_v2 = vmov 0.0|0.0   ;;  %vm1522_vm1 = vmmov 1   ;;  %v65_v7 = vlaneseq }
  0x24   :  { %1332 = vmatprep.subr.bf16.mxu0 %v1521_v2  ;;  %v1593_v3 = vpack.c.bf16 %v60_v1, %v59_v0  ;;  %vm1595_vm2 = vmpackc.low %vm76_vm0, %vm1522_vm1  ;;  %1336 = vmatprep.subr.bf16.mxu1 %v1521_v2  ;;  %vm1523_vm3 = vmmov 0   ;;  %v1524_v5 = vmov 0.0   ;;  %v67_v6 = vld [vmem:[%s1851_s1] sm:$0x1]  ;;  %vm72_vm4 = vcmask 80896   ;;  %s1526_s25 = smov 108  }
  0x25   :  { %1280 = vmatprep.mubr.msk.f32.mxu0 %vm1523_vm3, %v1524_v5  ;;  %1287 = vmatprep.mubr.msk.f32.mxu1 %vm1523_vm3, %v1524_v5  ;;  %v1525_v8 = vmov 1966171168   ;;  %v162_v11 = vshrl.u32 %v65_v7, 7  ;;  %v1626_v12 = vld [vmem:[%s1854_s4 + $0x1] sm:$0x1]  ;;  %s68_s26 = sld [smem:[#allocation3]] }
  0x26   :  { %1335 = vmatpush3.bf16.msk.msra.mxu0 %vm1595_vm2, %v1593_v3  ;;  %1339 = vmatpush3.bf16.msk.msra.mxu1 %vm1595_vm2, %v1593_v3  ;;  %v159_v9 = vunpack.c.l.s4 %v1525_v8  ;;  %v1637_v19 = vld [vmem:[%s1852_s2] sm:$0x1]  ;;  %s1527_s2 = smov 20   ;;  %s1529_s9 = smov 10   ;;  %vm206_vm5 = vcmask 73728  }
  0x27   :  { %1340 = vmatprep.subr.bf16.mxu0 %v1521_v2  ;;  %1344 = vmatprep.subr.bf16.mxu1 %v1521_v2  ;;  %v1643_v22 = vld [vmem:[%s1854_s4] sm:$0x1]  ;;  %s1528_s4 = smov 118   ;;  %v1649_v39 = vsub.s32 0, %v162_v11  ;;  %s1223_s10 = sld [smem:[#allocation3 + $0x1]] }
  0x28   :  { %v160_v10 = vunpack.c.0.s8 %v159_v9  ;;  %s1227_s11 = sld [smem:[#allocation3 + $0x2]]  ;;  %s1231_s12 = sld [smem:[#allocation3 + $0x3]] }
  0x29   :  { %1281 = vmatmul.mubr.msk.f32.vlgmr.msra.gmra.mrb[0].mxu0 %vm72_vm4, %v67_v6  ;;  %s1235_s13 = sld [smem:[#allocation3 + $0x4]]  ;;  %s1239_s14 = sld [smem:[#allocation3 + $0x5]] }
  0x2a   :  { %1343 = vmatpush3.bf16.msk.msra.mxu0 %vm1595_vm2, %v1593_v3  ;;  %1294 = vmatprep.mubr.msk.f32.mxu0 %vm1523_vm3, %v1524_v5  ;;  %v1628_v13 = vsub.s32 %v160_v10, %v162_v11  ;;  %s1243_s15 = sld [smem:[#allocation3 + $0x6]]  ;;  %s1247_s17 = sld [smem:[#allocation3 + $0x7]] }
  0x2b   :  { %1348 = vmatprep.subr.bf16.mxu0 %v1521_v2  ;;  %v69_v20 = vstv %s68_s26 }
  0x2c   :  { %v70_v21 = vmul.f32 %v69_v20, %v1637_v19 }
  0x2d   :  { %v213_v48 = vstv %s1223_s10 }
  0x2e   :  { %v71_v23 = vadd.f32 %v70_v21, %v1643_v22  ;;  %v214_v49 = vmul.f32 %v213_v48, %v1637_v19 }
  0x30   :  { %v215_v50 = vadd.f32 %v214_v49, %v1643_v22 }
  0xfc   :  { %v146_v14 = vpop.f32.mrb[0].mxu0 }
  0xfd   :  { %v147_v15 = vadd.f32 %v146_v14, %v1626_v12  ;;  %v1282_v16 = vpop.f32.mrb[1].mxu0 }
  0xfe   :  { %v350_v16 = vstv %s1227_s11 }
  0xff   :  { %v164_v17 = vrot.slane %v147_v15, %v1628_v13  ;;  %v150_v24 = vadd.f32 %v147_v15, %v71_v23 }
 0x101   :  { %v171_v18 = vrot.slane %v164_v17, %v1628_v13  ;;  %v1222_v25 = vmul.f32 -1.442695, %v150_v24  ;;  %v351_v17 = vmul.f32 %v350_v16, %v1637_v19 }
 0x103   :  { %172 = vrot.lane.b32.xlu0 %v171_v18, %s1526_s25  ;;  %1379 = vpow2.f32 %v1222_v25  ;;  %v352_v18 = vadd.f32 %v351_v17, %v1643_v22 }
 0x10d   :  { %v1380_v26 = vpop.eup %1379 }
 0x10e   :  { %v154_v27 = vadd.f32 1.0, %v1380_v26 }
 0x110   :  { %1381 = vrcp.f32 %v154_v27 }
 0x11a   :  { %v1382_v28 = vpop.eup %1381 }
 0x11b   :  { %v182_v35 = vsub.f32 1.0, %v1382_v28 }
 0x175   :  { %v173_v29 = vpop.permute.xlu0 %172 }
 0x176   :  { %v175_v30 = vmul.f32 %v1382_v28, %v173_v29 }
 0x178   :  { %177 = vrot.lane.b32.xlu0 %v175_v30, %s1527_s2 }
 0x1ea   :  { %v178_v31 = vpop.permute.xlu0 %177 }
 0x1eb   :  { %v180_v32 = vadd.f32 %v178_v31, %v71_v23 }
 0x1ed   :  { %1383 = vtanh.f32 %v180_v32 }
 0x1f7   :  { %v1384_v33 = vpop.eup %1383 }
 0x1f8   :  { %184 = vrot.lane.b32.xlu1 %v1384_v33, %s1528_s4 }
 0x1fc   :  { %188 = vrot.lane.b32.xlu1 %v67_v6, %s1529_s9 }
 0x26a   :  { %v185_v34 = vpop.permute.xlu1 %184 }
 0x26b   :  { %v187_v37 = vmul.f32 %v185_v34, %v182_v35 }
 0x26e   :  { %v189_v36 = vpop.permute.xlu1 %188 }
 0x26f   :  { %v191_v38 = vmul.f32 %v1382_v28, %v189_v36 }
 0x271   :  { %v1651_v40 = vadd.f32 %v191_v38, %v187_v37 }
 0x273   :  { %v220_v41 = vrot.slane %v1651_v40, %v1649_v39 }
 0x275   :  { %221 = vrot.lane.b32.xlu0 %v220_v41, %s1528_s4 }
 0x2e7   :  { %v222_v42 = vpop.permute.xlu0 %221 }
 0x2e8   :  { %1288 = vmatmul.mubr.msk.f32.vlgmr.msra.gmra.mrb[0].mxu1 %vm72_vm4, %v222_v42 }
 0x2e9   :  { %1347 = vmatpush3.bf16.msk.msra.mxu1 %vm1595_vm2, %v1593_v3  ;;  %1301 = vmatprep.mubr.msk.f32.mxu1 %vm1523_vm3, %v1524_v5 }
 0x2ea   :  { %1352 = vmatprep.subr.bf16.mxu1 %v1521_v2 }
 0x3bb   :  { %v291_v43 = vpop.f32.mrb[0].mxu1 }
 0x3bc   :  { %v292_v44 = vadd.f32 %v291_v43, %v1626_v12  ;;  %v1289_v45 = vpop.f32.mrb[1].mxu1 }
 0x3bd   :  { %v487_v45 = vstv %s1231_s12 }
 0x3be   :  { %v309_v46 = vrot.slane %v292_v44, %v1628_v13  ;;  %v295_v51 = vadd.f32 %v292_v44, %v215_v50 }
 0x3c0   :  { %v316_v47 = vrot.slane %v309_v46, %v1628_v13  ;;  %v1226_v52 = vmul.f32 -1.442695, %v295_v51  ;;  %v488_v46 = vmul.f32 %v487_v45, %v1637_v19 }
 0x3c2   :  { %317 = vrot.lane.b32.xlu1 %v316_v47, %s1526_s25  ;;  %1385 = vpow2.f32 %v1226_v52  ;;  %v489_v47 = vadd.f32 %v488_v46, %v1643_v22 }
 0x3cc   :  { %v1386_v53 = vpop.eup %1385 }
 0x3cd   :  { %v299_v54 = vadd.f32 1.0, %v1386_v53 }
 0x3cf   :  { %1387 = vrcp.f32 %v299_v54 }
 0x3d9   :  { %v1388_v55 = vpop.eup %1387 }
 0x3da   :  { %v327_v61 = vsub.f32 1.0, %v1388_v55  ;;  %v333_v63 = vmul.f32 %v1388_v55, %v1651_v40 }
 0x434   :  { %v318_v56 = vpop.permute.xlu1 %317 }
 0x435   :  { %v320_v57 = vmul.f32 %v1388_v55, %v318_v56 }
 0x437   :  { %322 = vrot.lane.b32.xlu0 %v320_v57, %s1527_s2 }
 0x4a9   :  { %v323_v58 = vpop.permute.xlu0 %322 }
 0x4aa   :  { %v325_v59 = vadd.f32 %v323_v58, %v215_v50 }
 0x4ac   :  { %1389 = vtanh.f32 %v325_v59 }
 0x4b6   :  { %v1390_v60 = vpop.eup %1389 }
 0x4b7   :  { %329 = vrot.lane.b32.xlu1 %v1390_v60, %s1528_s4 }
 0x529   :  { %v330_v62 = vpop.permute.xlu1 %329 }
 0x52a   :  { %v332_v0 = vmul.f32 %v330_v62, %v327_v61 }
 0x52c   :  { %v1672_v1 = vadd.f32 %v333_v63, %v332_v0 }
 0x52e   :  { %v357_v6 = vrot.slane %v1672_v1, %v1649_v39 }
 0x530   :  { %358 = vrot.lane.b32.xlu0 %v357_v6, %s1528_s4 }
 0x5a2   :  { %v359_v8 = vpop.permute.xlu0 %358 }
 0x5a3   :  { %1295 = vmatmul.mubr.msk.f32.vlgmr.msra.gmra.mrb[2].mxu0 %vm72_vm4, %v359_v8 }
 0x5a4   :  { %1351 = vmatpush3.bf16.msk.msra.mxu0 %vm1595_vm2, %v1593_v3  ;;  %1308 = vmatprep.mubr.msk.f32.mxu0 %vm1523_vm3, %v1524_v5 }
 0x5a5   :  { %1356 = vmatprep.subr.bf16.mxu0 %v1521_v2 }
 0x676   :  { %v428_v9 = vpop.f32.mrb[2].mxu0 }
 0x677   :  { %v429_v10 = vadd.f32 %v428_v9, %v1626_v12  ;;  %v1296_v11 = vpop.f32.mrb[3].mxu0 }
 0x678   :  { %v624_v11 = vstv %s1235_s13 }
 0x679   :  { %v446_v14 = vrot.slane %v429_v10, %v1628_v13  ;;  %v432_v20 = vadd.f32 %v429_v10, %v352_v18 }
 0x67b   :  { %v453_v15 = vrot.slane %v446_v14, %v1628_v13  ;;  %v1230_v21 = vmul.f32 -1.442695, %v432_v20  ;;  %v625_v14 = vmul.f32 %v624_v11, %v1637_v19 }
 0x67d   :  { %454 = vrot.lane.b32.xlu1 %v453_v15, %s1526_s25  ;;  %1391 = vpow2.f32 %v1230_v21  ;;  %v626_v15 = vadd.f32 %v625_v14, %v1643_v22 }
 0x687   :  { %v1392_v23 = vpop.eup %1391 }
 0x688   :  { %v436_v24 = vadd.f32 1.0, %v1392_v23 }
 0x68a   :  { %1393 = vrcp.f32 %v436_v24 }
 0x694   :  { %v1394_v25 = vpop.eup %1393 }
 0x695   :  { %v464_v31 = vsub.f32 1.0, %v1394_v25  ;;  %v470_v33 = vmul.f32 %v1394_v25, %v1672_v1 }
 0x6ef   :  { %v455_v26 = vpop.permute.xlu1 %454 }
 0x6f0   :  { %v457_v27 = vmul.f32 %v1394_v25, %v455_v26 }
 0x6f2   :  { %459 = vrot.lane.b32.xlu0 %v457_v27, %s1527_s2 }
 0x764   :  { %v460_v28 = vpop.permute.xlu0 %459 }
 0x765   :  { %v462_v29 = vadd.f32 %v460_v28, %v352_v18 }
 0x767   :  { %1395 = vtanh.f32 %v462_v29 }
 0x771   :  { %v1396_v30 = vpop.eup %1395 }
 0x772   :  { %466 = vrot.lane.b32.xlu1 %v1396_v30, %s1528_s4 }
 0x7e4   :  { %v467_v32 = vpop.permute.xlu1 %466 }
 0x7e5   :  { %v469_v34 = vmul.f32 %v467_v32, %v464_v31 }
 0x7e7   :  { %v1693_v35 = vadd.f32 %v470_v33, %v469_v34 }
 0x7e9   :  { %v494_v36 = vrot.slane %v1693_v35, %v1649_v39 }
 0x7eb   :  { %495 = vrot.lane.b32.xlu0 %v494_v36, %s1528_s4 }
 0x85d   :  { %v496_v37 = vpop.permute.xlu0 %495 }
 0x85e   :  { %1302 = vmatmul.mubr.msk.f32.vlgmr.msra.gmra.mrb[2].mxu1 %vm72_vm4, %v496_v37 }
 0x85f   :  { %1355 = vmatpush3.bf16.msk.msra.mxu1 %vm1595_vm2, %v1593_v3  ;;  %1315 = vmatprep.mubr.msk.f32.mxu1 %vm1523_vm3, %v1524_v5 }
 0x860   :  { %1360 = vmatprep.subr.bf16.mxu1 %v1521_v2 }
 0x931   :  { %v565_v38 = vpop.f32.mrb[2].mxu1 }
 0x932   :  { %v566_v41 = vadd.f32 %v565_v38, %v1626_v12  ;;  %v1303_v42 = vpop.f32.mrb[3].mxu1 }
 0x934   :  { %v583_v43 = vrot.slane %v566_v41, %v1628_v13  ;;  %v569_v48 = vadd.f32 %v566_v41, %v489_v47 }
 0x936   :  { %v590_v44 = vrot.slane %v583_v43, %v1628_v13  ;;  %v1234_v49 = vmul.f32 -1.442695, %v569_v48  ;;  %v761_v43 = vstv %s1239_s14 }
 0x938   :  { %591 = vrot.lane.b32.xlu1 %v590_v44, %s1526_s25  ;;  %1397 = vpow2.f32 %v1234_v49  ;;  %v762_v44 = vmul.f32 %v761_v43, %v1637_v19 }
 0x93a   :  { %v763_v4 = vadd.f32 %v762_v44, %v1643_v22 }
 0x942   :  { %v1398_v2 = vpop.eup %1397 }
 0x943   :  { %v573_v50 = vadd.f32 1.0, %v1398_v2 }
 0x945   :  { %1399 = vrcp.f32 %v573_v50 }
 0x94f   :  { %v1400_v51 = vpop.eup %1399 }
 0x950   :  { %v601_v57 = vsub.f32 1.0, %v1400_v51  ;;  %v607_v59 = vmul.f32 %v1400_v51, %v1693_v35 }
 0x9aa   :  { %v592_v52 = vpop.permute.xlu1 %591 }
 0x9ab   :  { %v594_v53 = vmul.f32 %v1400_v51, %v592_v52 }
 0x9ad   :  { %596 = vrot.lane.b32.xlu0 %v594_v53, %s1527_s2 }
 0xa1f   :  { %v597_v54 = vpop.permute.xlu0 %596 }
 0xa20   :  { %v599_v55 = vadd.f32 %v597_v54, %v489_v47 }
 0xa22   :  { %1401 = vtanh.f32 %v599_v55 }
 0xa2c   :  { %v1402_v56 = vpop.eup %1401 }
 0xa2d   :  { %603 = vrot.lane.b32.xlu1 %v1402_v56, %s1528_s4 }
 0xa9f   :  { %v604_v58 = vpop.permute.xlu1 %603 }
 0xaa0   :  { %v606_v60 = vmul.f32 %v604_v58, %v601_v57 }
 0xaa2   :  { %v1714_v61 = vadd.f32 %v607_v59, %v606_v60 }
 0xaa4   :  { %v631_v62 = vrot.slane %v1714_v61, %v1649_v39 }
 0xaa6   :  { %632 = vrot.lane.b32.xlu0 %v631_v62, %s1528_s4 }
 0xb18   :  { %v633_v63 = vpop.permute.xlu0 %632 }
 0xb19   :  { %1309 = vmatmul.mubr.msk.f32.vlgmr.msra.gmra.mrb[4].mxu0 %vm72_vm4, %v633_v63 }
 0xb1a   :  { %1359 = vmatpush3.bf16.msk.msra.mxu0 %vm1595_vm2, %v1593_v3  ;;  %1322 = vmatprep.mubr.msk.f32.mxu0 %vm1523_vm3, %v1524_v5 }
 0xbec   :  { %v702_v0 = vpop.f32.mrb[4].mxu0 }
 0xbed   :  { %v703_v6 = vadd.f32 %v702_v0, %v1626_v12  ;;  %v1310_v8 = vpop.f32.mrb[5].mxu0 }
 0xbef   :  { %v720_v9 = vrot.slane %v703_v6, %v1628_v13  ;;  %v706_v16 = vadd.f32 %v703_v6, %v626_v15  ;;  %v898_v6 = vstv %s1243_s15 }
 0xbf0   :  { %v899_v8 = vmul.f32 %v898_v6, %v1637_v19 }
 0xbf1   :  { %v727_v10 = vrot.slane %v720_v9, %v1628_v13  ;;  %v1238_v17 = vmul.f32 -1.442695, %v706_v16 }
 0xbf2   :  { %v900_v9 = vadd.f32 %v899_v8, %v1643_v22 }
 0xbf3   :  { %728 = vrot.lane.b32.xlu1 %v727_v10, %s1526_s25  ;;  %1403 = vpow2.f32 %v1238_v17 }
 0xbfd   :  { %v1404_v18 = vpop.eup %1403 }
 0xbfe   :  { %v710_v20 = vadd.f32 1.0, %v1404_v18 }
 0xc00   :  { %1405 = vrcp.f32 %v710_v20 }
 0xc0a   :  { %v1406_v21 = vpop.eup %1405 }
 0xc0b   :  { %v738_v28 = vsub.f32 1.0, %v1406_v21  ;;  %v744_v30 = vmul.f32 %v1406_v21, %v1714_v61 }
 0xc65   :  { %v729_v23 = vpop.permute.xlu1 %728 }
 0xc66   :  { %v731_v24 = vmul.f32 %v1406_v21, %v729_v23 }
 0xc68   :  { %733 = vrot.lane.b32.xlu0 %v731_v24, %s1527_s2 }
 0xcda   :  { %v734_v25 = vpop.permute.xlu0 %733 }
 0xcdb   :  { %v736_v26 = vadd.f32 %v734_v25, %v626_v15 }
 0xcdd   :  { %1407 = vtanh.f32 %v736_v26 }
 0xce7   :  { %v1408_v27 = vpop.eup %1407 }
 0xce8   :  { %740 = vrot.lane.b32.xlu1 %v1408_v27, %s1528_s4 }
 0xd5a   :  { %v741_v29 = vpop.permute.xlu1 %740 }
 0xd5b   :  { %v743_v31 = vmul.f32 %v741_v29, %v738_v28 }
 0xd5d   :  { %v1734_v32 = vadd.f32 %v744_v30, %v743_v31 }
 0xd5f   :  { %v768_v33 = vrot.slane %v1734_v32, %v1649_v39 }
 0xd61   :  { %769 = vrot.lane.b32.xlu0 %v768_v33, %s1528_s4 }
 0xdd3   :  { %v770_v34 = vpop.permute.xlu0 %769 }
 0xdd4   :  { %1316 = vmatmul.mubr.msk.f32.vlgmr.msra.gmra.mrb[4].mxu1 %vm72_vm4, %v770_v34 }
 0xdd5   :  { %1363 = vmatpush3.bf16.msk.msra.mxu1 %vm1595_vm2, %v1593_v3  ;;  %1329 = vmatprep.mubr.msk.f32.mxu1 %vm1523_vm3, %v1524_v5 }
 0xea7   :  { %v839_v36 = vpop.f32.mrb[4].mxu1 }
 0xea8   :  { %v840_v37 = vadd.f32 %v839_v36, %v1626_v12  ;;  %v1317_v38 = vpop.f32.mrb[5].mxu1 }
 0xea9   :  { %v63_v38 = vld [vmem:[%s1855_s5] sm:$0x1]  ;;  %s1530_s5 = smov [#allocation9]  }
 0xeaa   :  { %v857_v41 = vrot.slane %v840_v37, %v1628_v13  ;;  %v843_v3 = vadd.f32 %v840_v37, %v763_v4  ;;  %s1206_s18 = sshll.u32 %s1530_s5, 4  ;;  %s1207_s18 = int_to_ptr.vmem [resolvable:$true] %s1206_s18 }
 0xeab   :  { %s1465_s19 = scalar_lea.vmem %s1207_s18, 16  ;;  %s1469_s20 = scalar_lea.vmem %s1207_s18, 32 }
 0xeac   :  { %v864_v42 = vrot.slane %v857_v41, %v1628_v13  ;;  %v1242_v45 = vmul.f32 -1.442695, %v843_v3  ;;  %v1035_v41 = vstv %s1247_s17  ;;  %p1466_p13 = scmp.ne.s32.totalorder %s1207_s18, %s1465_s19  ;;  %p1470_p0 = scmp.lt.s32.totalorder %s1207_s18, %s1207_s18 }
 0xead   :  { %p1471_p1 = scmp.lt.s32.totalorder %s1469_s20, %s1465_s19 }
 0xeae   :  { %865 = vrot.lane.b32.xlu1 %v864_v42, %s1526_s25  ;;  %1409 = vpow2.f32 %v1242_v45  ;;  %v1036_v42 = vmul.f32 %v1035_v41, %v1637_v19 }
 0xeaf   :  { %p1472_p2 = por %p1471_p1, %p1470_p0 }
 0xeb0   :  { %v1037_v43 = vadd.f32 %v1036_v42, %v1643_v22 }
 0xeb1   :  { %p1473_p3 = pnand %p1472_p2, %p1466_p13 }
 0xeb8   :  { %v1410_v5 = vpop.eup %1409 }
 0xeb9   :  { %v847_v46 = vadd.f32 1.0, %v1410_v5 }
 0xebb   :  { %1411 = vrcp.f32 %v847_v46 }
 0xec5   :  { %v1412_v47 = vpop.eup %1411 }
 0xec6   :  { %v875_v52 = vsub.f32 1.0, %v1412_v47  ;;  %v881_v54 = vmul.f32 %v1412_v47, %v1734_v32 }
 0xf20   :  { %v866_v48 = vpop.permute.xlu1 %865 }
 0xf21   :  { %v868_v49 = vmul.f32 %v1412_v47, %v866_v48 }
 0xf23   :  { %870 = vrot.lane.b32.xlu0 %v868_v49, %s1527_s2 }
 0xf95   :  { %v871_v2 = vpop.permute.xlu0 %870 }
 0xf96   :  { %v873_v50 = vadd.f32 %v871_v2, %v763_v4 }
 0xf98   :  { %1413 = vtanh.f32 %v873_v50 }
 0xfa2   :  { %v1414_v51 = vpop.eup %1413 }
 0xfa3   :  { %877 = vrot.lane.b32.xlu1 %v1414_v51, %s1528_s4 }
0x1015   :  { %v878_v53 = vpop.permute.xlu1 %877 }
0x1016   :  { %v880_v55 = vmul.f32 %v878_v53, %v875_v52 }
0x1018   :  { %v1754_v56 = vadd.f32 %v881_v54, %v880_v55 }
0x101a   :  { %v905_v57 = vrot.slane %v1754_v56, %v1649_v39 }
0x101c   :  { %906 = vrot.lane.b32.xlu0 %v905_v57, %s1528_s4 }
0x108e   :  { %v907_v58 = vpop.permute.xlu0 %906 }
0x108f   :  { %1323 = vmatmul.mubr.msk.f32.vlgmr.msra.gmra.mrb[6].mxu0 %vm72_vm4, %v907_v58 }
0x1162   :  { %v976_v59 = vpop.f32.mrb[6].mxu0 }
0x1163   :  { %v977_v60 = vadd.f32 %v976_v59, %v1626_v12  ;;  %v1324_v62 = vpop.f32.mrb[7].mxu0 }
0x1165   :  { %v994_v63 = vrot.slane %v977_v60, %v1628_v13  ;;  %v980_v10 = vadd.f32 %v977_v60, %v900_v9 }
0x1167   :  { %v1001_v0 = vrot.slane %v994_v63, %v1628_v13  ;;  %v1246_v11 = vmul.f32 -1.442695, %v980_v10 }
0x1169   :  { %1002 = vrot.lane.b32.xlu1 %v1001_v0, %s1526_s25  ;;  %1415 = vpow2.f32 %v1246_v11 }
0x1173   :  { %v1416_v14 = vpop.eup %1415 }
0x1174   :  { %v984_v15 = vadd.f32 1.0, %v1416_v14 }
0x1176   :  { %1417 = vrcp.f32 %v984_v15  ;;  %v66_v15 = vand.u32 127, %v65_v7 }
0x1178   :  { %vm210_vm6 = vcmp.eq.s32.totalorder %v66_v15, 0  ;;  %vm347_vm7 = vcmp.eq.s32.totalorder %v66_v15, 1 }
0x1180   :  { %v1418_v16 = vpop.eup %1417 }
0x1181   :  { %v1012_v24 = vsub.f32 1.0, %v1418_v16  ;;  %v1018_v26 = vmul.f32 %v1418_v16, %v1754_v56 }
0x11db   :  { %v1003_v17 = vpop.permute.xlu1 %1002 }
0x11dc   :  { %v1005_v18 = vmul.f32 %v1418_v16, %v1003_v17 }
0x11de   :  { %1007 = vrot.lane.b32.xlu0 %v1005_v18, %s1527_s2 }
0x1250   :  { %v1008_v20 = vpop.permute.xlu0 %1007 }
0x1251   :  { %v1010_v21 = vadd.f32 %v1008_v20, %v900_v9 }
0x1253   :  { %1419 = vtanh.f32 %v1010_v21 }
0x125d   :  { %v1420_v23 = vpop.eup %1419 }
0x125e   :  { %1014 = vrot.lane.b32.xlu1 %v1420_v23, %s1528_s4 }
0x12d0   :  { %v1015_v25 = vpop.permute.xlu1 %1014 }
0x12d1   :  { %v1017_v27 = vmul.f32 %v1015_v25, %v1012_v24 }
0x12d3   :  { %v1769_v28 = vadd.f32 %v1018_v26, %v1017_v27 }
0x12d5   :  { %v1042_v29 = vrot.slane %v1769_v28, %v1649_v39 }
0x12d7   :  { %1043 = vrot.lane.b32.xlu0 %v1042_v29, %s1528_s4 }
0x1349   :  { %v1044_v30 = vpop.permute.xlu0 %1043 }
0x134a   :  { %1330 = vmatmul.mubr.msk.f32.vlgmr.msra.gmra.mrb[6].mxu1 %vm72_vm4, %v1044_v30 }
0x141d   :  { %v1113_v31 = vpop.f32.mrb[6].mxu1 }
0x141e   :  { %v1114_v33 = vadd.f32 %v1113_v31, %v1626_v12  ;;  %v1331_v34 = vpop.f32.mrb[7].mxu1 }
0x1420   :  { %v1131_v36 = vrot.slane %v1114_v33, %v1628_v13  ;;  %v1117_v12 = vadd.f32 %v1114_v33, %v1037_v43 }
0x1422   :  { %v1138_v37 = vrot.slane %v1131_v36, %v1628_v13  ;;  %v1250_v44 = vmul.f32 -1.442695, %v1117_v12 }
0x1424   :  { %1139 = vrot.lane.b32.xlu1 %v1138_v37, %s1526_s25  ;;  %1421 = vpow2.f32 %v1250_v44 }
0x1428   :  { %194 = vrot.lane.b32.xlu1 %v63_v38, %s1529_s9 }
0x142e   :  { %v1422_v4 = vpop.eup %1421 }
0x142f   :  { %v1121_v3 = vadd.f32 1.0, %v1422_v4 }
0x1431   :  { %1423 = vrcp.f32 %v1121_v3 }
0x143b   :  { %v1424_v13 = vpop.eup %1423 }
0x143c   :  { %v1149_v0 = vsub.f32 1.0, %v1424_v13 }
0x1496   :  { %v1140_v45 = vpop.permute.xlu1 %1139 }
0x1497   :  { %v1142_v5 = vmul.f32 %v1424_v13, %v1140_v45 }
0x1499   :  { %1144 = vrot.lane.b32.xlu0 %v1142_v5, %s1527_s2 }
0x149a   :  { %v195_v46 = vpop.permute.xlu1 %194 }
0x149b   :  { %v197_v47 = vmul.f32 %v195_v46, %v1651_v40  ;;  %v335_v19 = vmul.f32 %v1672_v1, %v195_v46  ;;  %v609_v1 = vmul.f32 %v1714_v61, %v195_v46  ;;  %v1020_v54 = vmul.f32 %v1769_v28, %v195_v46 }
0x149c   :  { %v472_v58 = vmul.f32 %v1693_v35, %v195_v46  ;;  %v746_v60 = vmul.f32 %v1734_v32, %v195_v46  ;;  %v883_v62 = vmul.f32 %v1754_v56, %v195_v46  ;;  %v1155_v35 = vmul.f32 %v1424_v13, %v1769_v28 }
0x149d   :  { %v202_v48 = vrot.slane %v197_v47, %v1649_v39  ;;  %v340_v22 = vrot.slane %v335_v19, %v1649_v39  ;;  %v614_v53 = vrot.slane %v609_v1, %v1649_v39  ;;  %v1025_v55 = vrot.slane %v1020_v54, %v1649_v39 }
0x149e   :  { %v477_v59 = vrot.slane %v472_v58, %v1649_v39  ;;  %v751_v61 = vrot.slane %v746_v60, %v1649_v39  ;;  %v888_v63 = vrot.slane %v883_v62, %v1649_v39 }
0x149f   :  { %203 = vrot.lane.b32.xlu1 %v202_v48, %s1528_s4 }
0x14a3   :  { %341 = vrot.lane.b32.xlu1 %v340_v22, %s1528_s4 }
0x150b   :  { %v1145_v49 = vpop.permute.xlu0 %1144 }
0x150c   :  { %v1147_v2 = vadd.f32 %v1145_v49, %v1037_v43 }
0x150e   :  { %1425 = vtanh.f32 %v1147_v2 }
0x1511   :  { %v204_v50 = vpop.permute.xlu1 %203 }
0x1512   :  { %v207_v57 = vsel %vm206_vm5, %v204_v50, 0.0 }
0x1515   :  { %v342_v51 = vpop.permute.xlu1 %341 }
0x1516   :  { %v344_v52 = vsel %vm206_vm5, %v342_v51, 0.0 }
0x1517   :  { %345 = vadd.xlane.f32.xlu1 %v344_v52 }
0x1518   :  { %v1426_v40 = vpop.eup %1425 }
0x1519   :  { %1151 = vrot.lane.b32.xlu0 %v1426_v40, %s1528_s4 }
0x1528   :  { %615 = vrot.lane.b32.xlu1 %v614_v53, %s1528_s4 }
0x152c   :  { %1026 = vrot.lane.b32.xlu1 %v1025_v55, %s1528_s4 }
0x1538   :  { %208 = vadd.xlane.f32.xlu0 %v207_v57 }
0x154e   :  { %478 = vrot.lane.b32.xlu0 %v477_v59, %s1528_s4 }
0x1552   :  { %752 = vrot.lane.b32.xlu0 %v751_v61, %s1528_s4 }
0x1556   :  { %889 = vrot.lane.b32.xlu0 %v888_v63, %s1528_s4 }
0x158b   :  { %v1152_v6 = vpop.permute.xlu0 %1151 }
0x158c   :  { %v1154_v8 = vmul.f32 %v1152_v6, %v1149_v0 }
0x158e   :  { %v1156_v9 = vadd.f32 %v1155_v35, %v1154_v8 }
0x1590   :  { %v1157_v10 = vmul.f32 %v1156_v9, %v195_v46  ;;  %v1185_v7 = vrot.slane %v1156_v9, %v1649_v39 }
0x1592   :  { %v1162_v32 = vrot.slane %v1157_v10, %v1649_v39 }
0x1594   :  { %1163 = vrot.lane.b32.xlu0 %v1162_v32, %s1528_s4 }
0x15a4   :  { %v346_v11 = vpop.xlane.xlu1 %345 }
0x15a8   :  { %v616_v14 = vpop.permute.xlu1 %615 }
0x15a9   :  { %v618_v56 = vsel %vm206_vm5, %v616_v14, 0.0 }
0x15ac   :  { %v1027_v25 = vpop.permute.xlu1 %1026 }
0x15ad   :  { %v1029_v27 = vsel %vm206_vm5, %v1027_v25, 0.0 }
0x15b3   :  { %619 = vadd.xlane.f32.xlu0 %v618_v56 }
0x15c5   :  { %v209_v16 = vpop.xlane.xlu0 %208 }
0x15c6   :  { %v211_v17 = vsel %vm210_vm6, %v209_v16, 0.0 }
0x15c7   :  { %v348_v18 = vsel %vm347_vm7, %v346_v11, %v211_v17 }
0x15c9   :  { %v479_v20 = vpop.permute.xlu0 %478 }
0x15ca   :  { %v481_v21 = vsel %vm206_vm5, %v479_v20, 0.0 }
0x15cb   :  { %482 = vadd.xlane.f32.xlu1 %v481_v21 }
0x15cd   :  { %v753_v23 = vpop.permute.xlu0 %752 }
0x15ce   :  { %v755_v24 = vsel %vm206_vm5, %v753_v23, 0.0 }
0x15cf   :  { %756 = vadd.xlane.f32.xlu0 %v755_v24 }
0x15d1   :  { %v890_v26 = vpop.permute.xlu0 %889 }
0x15d2   :  { %v892_v28 = vsel %vm206_vm5, %v890_v26, 0.0 }
0x15d3   :  { %1030 = vadd.xlane.f32.xlu0 %v1029_v27  ;;  %893 = vadd.xlane.f32.xlu1 %v892_v28 }
0x15e9   :  { %1186 = vrot.lane.b32.xlu0 %v1185_v7, %s1528_s4 }
0x1606   :  { %v1164_v29 = vpop.permute.xlu0 %1163 }
0x1607   :  { %v1166_v30 = vsel %vm206_vm5, %v1164_v29, 0.0 }
0x1608   :  { %1167 = vadd.xlane.f32.xlu1 %v1166_v30 }
0x1640   :  { %v620_v31 = vpop.xlane.xlu0 %619 }
0x165c   :  { %v757_v33 = vpop.xlane.xlu0 %756 }
0x1660   :  { %v1031_v34 = vpop.xlane.xlu0 %1030 }
0x1664   :  { %v1187_v36 = vpop.permute.xlu0 %1186 }
0x1665   :  { %1189 = vst.msk [vmem:[#allocation9] sm:$0x1] %vm206_vm5, %v1187_v36 }
0x1666   :  { %1476 = shalt.err (!%p1473_p3)
}
0x1667   :  { %s1477_s3 = scalar_lea.hbm %s1858_s8, 16 }
0x1668   :  { %p1478_p4 = scmp.ne.s32.totalorder %s1858_s8, %s1477_s3  ;;  %p1481_p5 = scmp.lt.u32.totalorder %s1477_s3, %s1858_s8 }
0x166a   :  { %p1483_p6 = pnand %p1481_p5, %p1478_p4 }
0x166c   :  { %1486 = shalt.err (!%p1483_p6)
}
0x166d   :  { %1209 = dma.vmem_to_hbm [thread:$0]  %s1207_s18, 16, %s1858_s8, [#allocation10]   ;;  %vm484_vm8 = vcmp.eq.s32.totalorder %v66_v15, 2  ;;  %v483_v39 = vpop.xlane.xlu1 %482  ;;  %vm621_vm9 = vcmp.eq.s32.totalorder %v66_v15, 3  ;;  %vm758_vm10 = vcmp.eq.s32.totalorder %v66_v15, 4  ;;  %vm895_vm11 = vcmp.eq.s32.totalorder %v66_v15, 5 }
0x166e   :  { %v485_v37 = vsel %vm484_vm8, %v483_v39, %v348_v18  ;;  %vm1032_vm12 = vcmp.eq.s32.totalorder %v66_v15, 6  ;;  %vm1169_vm13 = vcmp.eq.s32.totalorder %v66_v15, 7  ;;  %v1171_v12 = vstv %s1856_s6  ;;  %s1531_s8 = smov [#allocation8]  }
0x166f   :  { %v622_v41 = vsel %vm621_vm9, %v620_v31, %v485_v37  ;;  %s1196_s30 = sshll.u32 %s1531_s8, 4  ;;  %vm1179_vm14 = vcmask 57344   ;;  %s1197_s30 = int_to_ptr.vmem [resolvable:$true] %s1196_s30 }
0x1670   :  { %v759_v42 = vsel %vm758_vm10, %v757_v33, %v622_v41  ;;  %s1487_s2 = scalar_lea.vmem %s1197_s30, 16  ;;  %s1491_s4 = scalar_lea.vmem %s1197_s30, 32 }
0x1671   :  { %v894_v38 = vpop.xlane.xlu1 %893  ;;  %p1488_p7 = scmp.ne.s32.totalorder %s1197_s30, %s1487_s2  ;;  %p1492_p8 = scmp.lt.s32.totalorder %s1197_s30, %s1197_s30 }
0x1672   :  { %v896_v43 = vsel %vm895_vm11, %v894_v38, %v759_v42  ;;  %p1493_p9 = scmp.lt.s32.totalorder %s1491_s4, %s1487_s2 }
0x1673   :  { %v1033_v44 = vsel %vm1032_vm12, %v1031_v34, %v896_v43 }
0x1674   :  { %p1494_p10 = por %p1493_p9, %p1492_p8 }
0x1676   :  { %p1495_p11 = pnand %p1494_p10, %p1488_p7 }
0x1695   :  { %v1168_v4 = vpop.xlane.xlu1 %1167 }
0x1696   :  { %v1170_v3 = vsel %vm1169_vm13, %v1168_v4, %v1033_v44 }
0x1697   :  { %v1172_v13 = vadd.f32 %v1171_v12, %v1170_v3 }
0x1699   :  { %v1251_v45 = vmul.f32 -1.442695, %v1172_v13 }
0x169b   :  { %1427 = vpow2.f32 %v1251_v45 }
0x16a5   :  { %v1428_v5 = vpop.eup %1427 }
0x16a6   :  { %v1176_v46 = vadd.f32 1.0, %v1428_v5 }
0x16a8   :  { %1429 = vrcp.f32 %v1176_v46 }
0x16b2   :  { %v1430_v47 = vpop.eup %1429 }
0x16b3   :  { %1180 = vst.msk [vmem:[#allocation8] sm:$0x1] %vm1179_vm14, %v1430_v47 }
0x16b4   :  { %1498 = shalt.err (!%p1495_p11)
}
0x16b5   :  { %s1499_s10 = scalar_lea.hbm %s1857_s7, 16 }
0x16b6   :  { %p1500_p12 = scmp.ne.s32.totalorder %s1857_s7, %s1499_s10  ;;  %p1503_p13 = scmp.lt.u32.totalorder %s1499_s10, %s1857_s7 }
0x16b8   :  { %p1505_p0 = pnand %p1503_p13, %p1500_p12 }
0x16ba   :  { %1508 = shalt.err (!%p1505_p0)
}
0x16bb   :  { %1199 = dma.vmem_to_hbm [thread:$0]  %s1197_s30, 16, %s1857_s7, [#allocation5]  }
0x16bc   :  { %1513 = dma.done.wait [#allocation5], 16  }
0x16bd   :  { %1514 = vsyncadd [#allocation5], 4294967280 }
0x16be   :  { %1515 = dma.done.wait [#allocation10], 16  }
0x16bf   :  { %1516 = vsyncadd [#allocation10], 4294967280 }
0x16c0   :  { %1216 = vsyncpa [#allocation4], 1 }
0x16c1   :  { %1217 = vsyncpa [#allocation5], 1 }
0x16c2   :  { %1218 = vsyncpa [#allocation10], 1 }
0x16c3   :  { %1219 = vsyncpa [#allocation6], 1 }

</bundles_post_ra>
